<compile_context>
chip_gen: v5e
topology: v5e:2x2
jax: 0.10.0
libtpu: 0.0.40
codegen_flags: <defaults>
</compile_context>

<pallas_src>
import jax
import jax.numpy as jnp
from jax.experimental import pallas as pl
from jax.experimental.pallas import tpu as pltpu


def _make_rnn_last_kernel(T, B):
    """Kernel factory: T and B are static Python ints (baked into the trace)."""

    def rnn_last_kernel(x_ref, wih_ref, whh_ref, b_ref, wfc_ref, bfc_ref, out_ref):
        # ---- hoisted input projection: one big MXU call, bias added once ----
        # x_ref: (T*B, D_in) time-major;  pre[t*B + b, :] = x[b, t] @ W_ih^T + (b_ih + b_hh)
        pre = (
            jnp.dot(x_ref[...], wih_ref[...], preferred_element_type=jnp.float32)
            + b_ref[...]
        )

        whh = whh_ref[...]                     # (H, H), kept resident for the loop
        H = whh.shape[0]

        # ---- serial recurrence: only h @ W_hh + pre[t] and tanh on the chain ----
        h = jnp.zeros((B, H), jnp.float32)
        for t in range(T):                     # static unroll (T is small & fixed)
            h = jnp.tanh(
                pre[t * B:(t + 1) * B, :]
                + jnp.dot(h, whh, preferred_element_type=jnp.float32)
            )

        # ---- final classifier on the last hidden state ----
        out_ref[...] = (
            jnp.dot(h, wfc_ref[...], preferred_element_type=jnp.float32)
            + bfc_ref[...]
        ).astype(out_ref.dtype)

    return rnn_last_kernel


def model_rnn_forward(x, params):
    """x: (B, T, D_in) float32 -> (B, num_class) float32."""
    B, T, D_in = x.shape
    w_ih, w_hh, b_ih, b_hh, w_fc, b_fc = (
        params["w_ih"], params["w_hh"], params["b_ih"],
        params["b_hh"], params["w_fc"], params["b_fc"],
    )
    H = w_ih.shape[0]
    C = w_fc.shape[0]

    # ---- layout plumbing (plain JAX glue, not compute hoisting) ----
    wih_t = jnp.transpose(w_ih)                       # (D_in, H)
    whh_t = jnp.transpose(w_hh)                       # (H, H)
    wfc_t = jnp.transpose(w_fc)                       # (H, C)
    b_rnn = (b_ih + b_hh).reshape(1, H)               # (1, H)
    bfc = b_fc.reshape(1, C)                          # (1, C)
    # time-major flatten so pre[t*B:(t+1)*B] is the contiguous batch block of step t
    x_tb = jnp.transpose(x, (1, 0, 2)).reshape(T * B, D_in)   # (T*B, D_in)

    grid_spec = pltpu.PrefetchScalarGridSpec(
        num_scalar_prefetch=0,
        grid=(1,),                                    # single invocation; loop is in-kernel
        in_specs=[
            pl.BlockSpec((T * B, D_in), lambda i: (0, 0)),   # x (whole, ~19 KB)
            pl.BlockSpec((D_in, H),     lambda i: (0, 0)),   # W_ih^T
            pl.BlockSpec((H, H),        lambda i: (0, 0)),   # W_hh^T
            pl.BlockSpec((1, H),        lambda i: (0, 0)),   # b_ih + b_hh
            pl.BlockSpec((H, C),        lambda i: (0, 0)),   # W_fc^T
            pl.BlockSpec((1, C),        lambda i: (0, 0)),   # b_fc
        ],
        out_specs=pl.BlockSpec((B, C), lambda i: (0, 0)),
    )

    return pl.pallas_call(
        _make_rnn_last_kernel(T, B),
        out_shape=jax.ShapeDtypeStruct((B, C), jnp.float32),
        grid_spec=grid_spec,
        compiler_params=pltpu.CompilerParams(
            dimension_semantics=("arbitrary",),
        ),
    )(x_tb, wih_t, whh_t, b_rnn, wfc_t, bfc)


def init_params(key, input_size, hidden_size, num_class):
    """Deterministic init matching nn.RNN + nn.Linear shapes
    (uniform(-1/sqrt(H), 1/sqrt(H)) like PyTorch's default)."""
    ks = jax.random.split(key, 6)
    bound = 1.0 / jnp.sqrt(hidden_size)
    u = lambda k, shape: jax.random.uniform(k, shape, jnp.float32, -bound, bound)
    return {
        "w_ih": u(ks[0], (hidden_size, input_size)),
        "w_hh": u(ks[1], (hidden_size, hidden_size)),
        "b_ih": u(ks[2], (hidden_size,)),
        "b_hh": u(ks[3], (hidden_size,)),
        "w_fc": u(ks[4], (num_class, hidden_size)),
        "b_fc": u(ks[5], (num_class,)),
    }


def reference_forward(x, params):
    """Pure-JAX reference of the PyTorch forward, for correctness check."""
    B, T, _ = x.shape
    H = params["w_ih"].shape[0]
    h = jnp.zeros((B, H), jnp.float32)
    for t in range(T):
        h = jnp.tanh(
            x[:, t, :] @ params["w_ih"].T + params["b_ih"]
            + h @ params["w_hh"].T + params["b_hh"]
        )
    return h @ params["w_fc"].T + params["b_fc"]


if __name__ == "__main__":
    # Small shapes consistent with the module's forward: (B, T, input_size)
    input_size, hidden_size, num_class = 300, 128, 24
    B, T = 2, 8

    key = jax.random.PRNGKey(0)
    kx, kp = jax.random.split(key)
    x = jax.random.normal(kx, (B, T, input_size), dtype=jnp.float32)
    params = init_params(kp, input_size, hidden_size, num_class)

    out = model_rnn_forward(x, params)
    out = jax.block_until_ready(out)

    ref = reference_forward(x, params)
    assert out.shape == (B, num_class)
    assert jnp.allclose(out, ref, atol=1e-4, rtol=1e-4), "mismatch vs reference"

    print("KERNEL_OK")
</pallas_src>

<mosaic_0001>
module attributes {stable_mosaic.version = 11 : i64} {
  func.func @rnn_last_kernel(%arg0: i32, %arg1: memref<16x300xf32, #tpu.memory_space<vmem>>, %arg2: memref<300x128xf32, #tpu.memory_space<vmem>>, %arg3: memref<128x128xf32, #tpu.memory_space<vmem>>, %arg4: memref<1x128xf32, #tpu.memory_space<vmem>>, %arg5: memref<128x24xf32, #tpu.memory_space<vmem>>, %arg6: memref<1x24xf32, #tpu.memory_space<vmem>>, %arg7: memref<2x24xf32, #tpu.memory_space<vmem>>) attributes {dimension_semantics = [#tpu.dimension_semantics<arbitrary>], iteration_bounds = array<i64: 1>, scalar_prefetch = 0 : i64, scratch_operands = 0 : i64, tpu.core_type = #tpu.core_type<tc>, window_params = [{pipeline_mode = #tpu.pipeline_mode<synchronous>, transform_indices = @transform_0, window_bounds = array<i64: 16, 300>}, {pipeline_mode = #tpu.pipeline_mode<synchronous>, transform_indices = @transform_1, window_bounds = array<i64: 300, 128>}, {pipeline_mode = #tpu.pipeline_mode<synchronous>, transform_indices = @transform_2, window_bounds = array<i64: 128, 128>}, {pipeline_mode = #tpu.pipeline_mode<synchronous>, transform_indices = @transform_3, window_bounds = array<i64: 1, 128>}, {pipeline_mode = #tpu.pipeline_mode<synchronous>, transform_indices = @transform_4, window_bounds = array<i64: 128, 24>}, {pipeline_mode = #tpu.pipeline_mode<synchronous>, transform_indices = @transform_5, window_bounds = array<i64: 1, 24>}, {pipeline_mode = #tpu.pipeline_mode<synchronous>, transform_indices = @transform_6, window_bounds = array<i64: 2, 24>}]} {
    %c0 = arith.constant 0 : index
    %c0_0 = arith.constant 0 : index
    %0 = vector.load %arg1[%c0, %c0_0] : memref<16x300xf32, #tpu.memory_space<vmem>>, vector<16x300xf32>
    %c0_1 = arith.constant 0 : index
    %c0_2 = arith.constant 0 : index
    %1 = vector.load %arg2[%c0_1, %c0_2] : memref<300x128xf32, #tpu.memory_space<vmem>>, vector<300x128xf32>
    %cst = arith.constant dense<0.000000e+00> : vector<16x128xf32>
    %2 = tpu.matmul %0, %1, %cst {dimension_numbers = #tpu.dot_dimension_numbers<[1], [0], [0], [1], [0, 0, 1, 1], [], []>} : vector<16x300xf32>, vector<300x128xf32>, vector<16x128xf32> -> vector<16x128xf32>
    %c0_3 = arith.constant 0 : index
    %c0_4 = arith.constant 0 : index
    %3 = vector.load %arg4[%c0_3, %c0_4] : memref<1x128xf32, #tpu.memory_space<vmem>>, vector<1x128xf32>
    %4 = vector.broadcast %3 : vector<1x128xf32> to vector<16x128xf32>
    %5 = arith.addf %2, %4 : vector<16x128xf32>
    %c0_5 = arith.constant 0 : index
    %c0_6 = arith.constant 0 : index
    %6 = vector.load %arg3[%c0_5, %c0_6] : memref<128x128xf32, #tpu.memory_space<vmem>>, vector<128x128xf32>
    %cst_7 = arith.constant 0.000000e+00 : f32
    %7 = vector.broadcast %cst_7 : f32 to vector<2x128xf32>
    %8 = vector.extract_strided_slice %5 {offsets = [0, 0], sizes = [2, 128], strides = [1, 1]} : vector<16x128xf32> to vector<2x128xf32>
    %cst_8 = arith.constant dense<0.000000e+00> : vector<2x128xf32>
    %9 = tpu.matmul %7, %6, %cst_8 {dimension_numbers = #tpu.dot_dimension_numbers<[1], [0], [0], [1], [0, 0, 1, 1], [], []>} : vector<2x128xf32>, vector<128x128xf32>, vector<2x128xf32> -> vector<2x128xf32>
    %10 = arith.addf %8, %9 : vector<2x128xf32>
    %11 = math.tanh %10 : vector<2x128xf32>
    %12 = vector.extract_strided_slice %5 {offsets = [2, 0], sizes = [2, 128], strides = [1, 1]} : vector<16x128xf32> to vector<2x128xf32>
    %cst_9 = arith.constant dense<0.000000e+00> : vector<2x128xf32>
    %13 = tpu.matmul %11, %6, %cst_9 {dimension_numbers = #tpu.dot_dimension_numbers<[1], [0], [0], [1], [0, 0, 1, 1], [], []>} : vector<2x128xf32>, vector<128x128xf32>, vector<2x128xf32> -> vector<2x128xf32>
    %14 = arith.addf %12, %13 : vector<2x128xf32>
    %15 = math.tanh %14 : vector<2x128xf32>
    %16 = vector.extract_strided_slice %5 {offsets = [4, 0], sizes = [2, 128], strides = [1, 1]} : vector<16x128xf32> to vector<2x128xf32>
    %cst_10 = arith.constant dense<0.000000e+00> : vector<2x128xf32>
    %17 = tpu.matmul %15, %6, %cst_10 {dimension_numbers = #tpu.dot_dimension_numbers<[1], [0], [0], [1], [0, 0, 1, 1], [], []>} : vector<2x128xf32>, vector<128x128xf32>, vector<2x128xf32> -> vector<2x128xf32>
    %18 = arith.addf %16, %17 : vector<2x128xf32>
    %19 = math.tanh %18 : vector<2x128xf32>
    %20 = vector.extract_strided_slice %5 {offsets = [6, 0], sizes = [2, 128], strides = [1, 1]} : vector<16x128xf32> to vector<2x128xf32>
    %cst_11 = arith.constant dense<0.000000e+00> : vector<2x128xf32>
    %21 = tpu.matmul %19, %6, %cst_11 {dimension_numbers = #tpu.dot_dimension_numbers<[1], [0], [0], [1], [0, 0, 1, 1], [], []>} : vector<2x128xf32>, vector<128x128xf32>, vector<2x128xf32> -> vector<2x128xf32>
    %22 = arith.addf %20, %21 : vector<2x128xf32>
    %23 = math.tanh %22 : vector<2x128xf32>
    %24 = vector.extract_strided_slice %5 {offsets = [8, 0], sizes = [2, 128], strides = [1, 1]} : vector<16x128xf32> to vector<2x128xf32>
    %cst_12 = arith.constant dense<0.000000e+00> : vector<2x128xf32>
    %25 = tpu.matmul %23, %6, %cst_12 {dimension_numbers = #tpu.dot_dimension_numbers<[1], [0], [0], [1], [0, 0, 1, 1], [], []>} : vector<2x128xf32>, vector<128x128xf32>, vector<2x128xf32> -> vector<2x128xf32>
    %26 = arith.addf %24, %25 : vector<2x128xf32>
    %27 = math.tanh %26 : vector<2x128xf32>
    %28 = vector.extract_strided_slice %5 {offsets = [10, 0], sizes = [2, 128], strides = [1, 1]} : vector<16x128xf32> to vector<2x128xf32>
    %cst_13 = arith.constant dense<0.000000e+00> : vector<2x128xf32>
    %29 = tpu.matmul %27, %6, %cst_13 {dimension_numbers = #tpu.dot_dimension_numbers<[1], [0], [0], [1], [0, 0, 1, 1], [], []>} : vector<2x128xf32>, vector<128x128xf32>, vector<2x128xf32> -> vector<2x128xf32>
    %30 = arith.addf %28, %29 : vector<2x128xf32>
    %31 = math.tanh %30 : vector<2x128xf32>
    %32 = vector.extract_strided_slice %5 {offsets = [12, 0], sizes = [2, 128], strides = [1, 1]} : vector<16x128xf32> to vector<2x128xf32>
    %cst_14 = arith.constant dense<0.000000e+00> : vector<2x128xf32>
    %33 = tpu.matmul %31, %6, %cst_14 {dimension_numbers = #tpu.dot_dimension_numbers<[1], [0], [0], [1], [0, 0, 1, 1], [], []>} : vector<2x128xf32>, vector<128x128xf32>, vector<2x128xf32> -> vector<2x128xf32>
    %34 = arith.addf %32, %33 : vector<2x128xf32>
    %35 = math.tanh %34 : vector<2x128xf32>
    %36 = vector.extract_strided_slice %5 {offsets = [14, 0], sizes = [2, 128], strides = [1, 1]} : vector<16x128xf32> to vector<2x128xf32>
    %cst_15 = arith.constant dense<0.000000e+00> : vector<2x128xf32>
    %37 = tpu.matmul %35, %6, %cst_15 {dimension_numbers = #tpu.dot_dimension_numbers<[1], [0], [0], [1], [0, 0, 1, 1], [], []>} : vector<2x128xf32>, vector<128x128xf32>, vector<2x128xf32> -> vector<2x128xf32>
    %38 = arith.addf %36, %37 : vector<2x128xf32>
    %39 = math.tanh %38 : vector<2x128xf32>
    %c0_16 = arith.constant 0 : index
    %c0_17 = arith.constant 0 : index
    %40 = vector.load %arg5[%c0_16, %c0_17] : memref<128x24xf32, #tpu.memory_space<vmem>>, vector<128x24xf32>
    %cst_18 = arith.constant dense<0.000000e+00> : vector<2x24xf32>
    %41 = tpu.matmul %39, %40, %cst_18 {dimension_numbers = #tpu.dot_dimension_numbers<[1], [0], [0], [1], [0, 0, 1, 1], [], []>} : vector<2x128xf32>, vector<128x24xf32>, vector<2x24xf32> -> vector<2x24xf32>
    %c0_19 = arith.constant 0 : index
    %c0_20 = arith.constant 0 : index
    %42 = vector.load %arg6[%c0_19, %c0_20] : memref<1x24xf32, #tpu.memory_space<vmem>>, vector<1x24xf32>
    %43 = vector.broadcast %42 : vector<1x24xf32> to vector<2x24xf32>
    %44 = arith.addf %41, %43 : vector<2x24xf32>
    %c0_21 = arith.constant 0 : index
    %c0_22 = arith.constant 0 : index
    %45 = vector.load %arg7[%c0_21, %c0_22] : memref<2x24xf32, #tpu.memory_space<vmem>>, vector<2x24xf32>
    tpu.vector_store %arg7[%c0_21, %c0_22], %44 {strides = array<i32>} : memref<2x24xf32, #tpu.memory_space<vmem>>, vector<2x24xf32>,
    return
  }
  func.func @transform_0(%arg0: i32) -> (i32, i32) {
    %c0_i32 = arith.constant 0 : i32
    %c0_i32_0 = arith.constant 0 : i32
    %c0_i32_1 = arith.constant 0 : i32
    return %c0_i32, %c0_i32_0 : i32, i32
  }
  func.func @transform_1(%arg0: i32) -> (i32, i32) {
    %c0_i32 = arith.constant 0 : i32
    %c0_i32_0 = arith.constant 0 : i32
    %c0_i32_1 = arith.constant 0 : i32
    return %c0_i32, %c0_i32_0 : i32, i32
  }
  func.func @transform_2(%arg0: i32) -> (i32, i32) {
    %c0_i32 = arith.constant 0 : i32
    %c0_i32_0 = arith.constant 0 : i32
    %c0_i32_1 = arith.constant 0 : i32
    return %c0_i32, %c0_i32_0 : i32, i32
  }
  func.func @transform_3(%arg0: i32) -> (i32, i32) {
    %c0_i32 = arith.constant 0 : i32
    %c0_i32_0 = arith.constant 0 : i32
    %c0_i32_1 = arith.constant 0 : i32
    return %c0_i32, %c0_i32_0 : i32, i32
  }
  func.func @transform_4(%arg0: i32) -> (i32, i32) {
    %c0_i32 = arith.constant 0 : i32
    %c0_i32_0 = arith.constant 0 : i32
    %c0_i32_1 = arith.constant 0 : i32
    return %c0_i32, %c0_i32_0 : i32, i32
  }
  func.func @transform_5(%arg0: i32) -> (i32, i32) {
    %c0_i32 = arith.constant 0 : i32
    %c0_i32_0 = arith.constant 0 : i32
    %c0_i32_1 = arith.constant 0 : i32
    return %c0_i32, %c0_i32_0 : i32, i32
  }
  func.func @transform_6(%arg0: i32) -> (i32, i32) {
    %c0_i32 = arith.constant 0 : i32
    %c0_i32_0 = arith.constant 0 : i32
    %c0_i32_1 = arith.constant 0 : i32
    return %c0_i32, %c0_i32_0 : i32, i32
  }
}

</mosaic_0001>

<bundles_post_ra>
// kernel: tpu_custom_call.1
= control target key start
LH: loop header
LB: loop body
LE: loop exit
PB: predicated region body
PF: predicated region fallthrough
CT: control target
= control target key end

     0   :  { %11 = vsyncpa [#allocation3], 0  ;;  %s895_s0 = inlined_call_operand.hbm [shape: f32[16,300], index: 0, kind: input, shape index: {}]   ;;  %s896_s1 = inlined_call_operand.hbm [shape: f32[300,128], index: 1, kind: input, shape index: {}]   ;;  %s897_s2 = inlined_call_operand.vmem [shape: f32[128,128], index: 2, kind: input, shape index: {}]   ;;  %s898_s3 = inlined_call_operand.vmem [shape: f32[1,128], index: 3, kind: input, shape index: {}]   ;;  %s899_s4 = inlined_call_operand.vmem [shape: f32[128,24], index: 4, kind: input, shape index: {}]   ;;  %s900_s5 = inlined_call_operand.vmem [shape: f32[1,24], index: 5, kind: input, shape index: {}]   ;;  %s901_s6 = inlined_call_operand.hbm [shape: f32[2,24], index: 6, kind: output, shape index: {}]  }
   0x1   :  { %12 = vsyncpa [#allocation6], 0 }
   0x2   :  { %13 = vsyncpa [#allocation4], 0  ;;  %s18_s23 = sshll.u32 %s895_s0, 4  ;;  %s579_s24 = smov [#allocation2]   ;;  %s19_s23 = int_to_ptr.hbm [resolvable:$true] %s18_s23 }
   0x3   :  { %s20_s25 = sshll.u32 %s579_s24, 4  ;;  %s31_s28 = sshll.u32 %s896_s1, 4  ;;  %s21_s25 = int_to_ptr.vmem [resolvable:$true] %s20_s25  ;;  %s32_s28 = int_to_ptr.hbm [resolvable:$true] %s31_s28 }
   0x4   :  { %s580_s29 = smov 384   ;;  %s581_s30 = smov 24  }
   0x5   :  { %26 = dma.hbm_to_vmem [thread:$0]  %s19_s23, 768, %s21_s25, [#allocation3], %s580_s29, %s580_s29, %s581_s30  }
   0x6   :  { %s582_s7 = smov [#allocation5]   ;;  %s583_s9 = smov 128  }
   0x7   :  { %s33_s8 = sshll.u32 %s582_s7, 4  ;;  %s584_s10 = smov 8   ;;  %s34_s8 = int_to_ptr.vmem [resolvable:$true] %s33_s8 }
   0x8   :  { %39 = dma.hbm_to_vmem [thread:$0]  %s32_s28, 4864, %s34_s8, [#allocation6], %s583_s9, %s583_s9, %s584_s10  }
   0x9   :  { %573 = dma.done.wait [#allocation3], 768  }
   0xa   :  { %574 = vsyncadd [#allocation3], 4294966528 }
   0xb   :  { %575 = dma.done.wait [#allocation6], 4864  }
   0xc   :  { %576 = vsyncadd [#allocation6], 4294962432  ;;  %v77_v0 = vld [vmem:[#allocation5 + $0x78] sm:$0xff]  ;;  %v631_v1 = vld [vmem:[%s897_s2 + $0x78] sm:$0xff]  ;;  %vm111_vm0 = vcmask 1043456   ;;  %vm104_vm1 = vcmask 359424  }
   0xd   :  { %v76_v2 = vld [vmem:[#allocation5 + $0x70] sm:$0xff]  ;;  %115 = vmatpush.msra.mxu0 %v77_v0  ;;  %200 = vmatpush.msra.mxu3 %v631_v1  ;;  %v93_v3 = vld [vmem:[#allocation5 + $0xf8] sm:$0xff]  ;;  %v637_v4 = vld [vmem:[%s897_s2 + $0x70] sm:$0xff]  ;;  %v585_v57 = vmov 0.0   ;;  %s586_s21 = smov [#allocation7]   ;;  %s461_s25 = sshll.u32 %s901_s6, 4  ;;  %s462_s25 = int_to_ptr.hbm [resolvable:$true] %s461_s25 }
   0xe   :  { %138 = vmatpush.msra.mxu1 %v93_v3  ;;  %v75_v5 = vld [vmem:[#allocation5 + $0x68] sm:$0xff]  ;;  %v92_v6 = vld [vmem:[#allocation5 + $0xf0] sm:$0xff]  ;;  %v642_v7 = vld [vmem:[%s897_s2 + $0x68] sm:$0xff]  ;;  %s459_s22 = sshll.u32 %s586_s21, 4  ;;  %vm452_vm2 = vcmask 189440   ;;  %s460_s22 = int_to_ptr.vmem [resolvable:$true] %s459_s22 }
   0xf   :  { %116 = vmatpush.msra.mxu0 %v76_v2  ;;  %201 = vmatpush.msra.mxu3 %v637_v4  ;;  %v91_v8 = vld [vmem:[#allocation5 + $0xe8] sm:$0xff]  ;;  %v74_v9 = vld [vmem:[#allocation5 + $0x60] sm:$0xff]  ;;  %v648_v10 = vld [vmem:[%s897_s2 + $0x60] sm:$0xff] }
  0x10   :  { %139 = vmatpush.msra.mxu1 %v92_v6  ;;  %v90_v11 = vld [vmem:[#allocation5 + $0xe0] sm:$0xff]  ;;  %v73_v12 = vld [vmem:[#allocation5 + $0x58] sm:$0xff]  ;;  %v654_v13 = vld [vmem:[%s897_s2 + $0x58] sm:$0xff] }
  0x11   :  { %117 = vmatpush.msra.mxu0 %v75_v5  ;;  %202 = vmatpush.msra.mxu3 %v642_v7  ;;  %v89_v14 = vld [vmem:[#allocation5 + $0xd8] sm:$0xff]  ;;  %v72_v15 = vld [vmem:[#allocation5 + $0x50] sm:$0xff]  ;;  %v660_v16 = vld [vmem:[%s897_s2 + $0x50] sm:$0xff] }
  0x12   :  { %140 = vmatpush.msra.mxu1 %v91_v8  ;;  %v88_v17 = vld [vmem:[#allocation5 + $0xd0] sm:$0xff]  ;;  %v99_v18 = vld [vmem:[#allocation5 + $0x128] sm:$0xf]  ;;  %v666_v20 = vld [vmem:[%s897_s2 + $0x48] sm:$0xff] }
  0x13   :  { %118 = vmatpush.msra.mxu0 %v74_v9  ;;  %203 = vmatpush.msra.mxu3 %v648_v10  ;;  %v71_v19 = vld [vmem:[#allocation5 + $0x48] sm:$0xff]  ;;  %v98_v21 = vld [vmem:[#allocation5 + $0x120] sm:$0xff]  ;;  %v672_v24 = vld [vmem:[%s897_s2 + $0x40] sm:$0xff] }
  0x14   :  { %141 = vmatpush.msra.mxu1 %v90_v11  ;;  %472 = vmatpush.msk.msra.mxu2 %vm111_vm0, %v99_v18  ;;  %v87_v22 = vld [vmem:[#allocation5 + $0xc8] sm:$0xff]  ;;  %v70_v23 = vld [vmem:[#allocation5 + $0x40] sm:$0xff]  ;;  %v97_v25 = vld [vmem:[#allocation5 + $0x118] sm:$0xff] }
  0x15   :  { %119 = vmatpush.msra.mxu0 %v73_v12  ;;  %204 = vmatpush.msra.mxu3 %v654_v13  ;;  %v86_v26 = vld [vmem:[#allocation5 + $0xc0] sm:$0xff]  ;;  %v96_v27 = vld [vmem:[#allocation5 + $0x110] sm:$0xff]  ;;  %v69_v28 = vld [vmem:[#allocation5 + $0x38] sm:$0xff] }
  0x16   :  { %142 = vmatpush.msra.mxu1 %v89_v14  ;;  %172 = vmatpush.msra.mxu2 %v98_v21  ;;  %v678_v29 = vld [vmem:[%s897_s2 + $0x38] sm:$0xff]  ;;  %v85_v30 = vld [vmem:[#allocation5 + $0xb8] sm:$0xff]  ;;  %v68_v32 = vld [vmem:[#allocation5 + $0x30] sm:$0xff] }
  0x17   :  { %120 = vmatpush.msra.mxu0 %v72_v15  ;;  %205 = vmatpush.msra.mxu3 %v660_v16  ;;  %v95_v31 = vld [vmem:[#allocation5 + $0x108] sm:$0xff]  ;;  %v684_v33 = vld [vmem:[%s897_s2 + $0x30] sm:$0xff]  ;;  %v84_v34 = vld [vmem:[#allocation5 + $0xb0] sm:$0xff] }
  0x18   :  { %143 = vmatpush.msra.mxu1 %v88_v17  ;;  %173 = vmatpush.msra.mxu2 %v97_v25  ;;  %v94_v35 = vld [vmem:[#allocation5 + $0x100] sm:$0xff]  ;;  %v67_v36 = vld [vmem:[#allocation5 + $0x28] sm:$0xff]  ;;  %v690_v37 = vld [vmem:[%s897_s2 + $0x28] sm:$0xff] }
  0x19   :  { %121 = vmatpush.msra.mxu0 %v71_v19  ;;  %206 = vmatpush.msra.mxu3 %v666_v20  ;;  %v83_v38 = vld [vmem:[#allocation5 + $0xa8] sm:$0xff]  ;;  %v58_v39 = vld [vmem:[#allocation2 + $0x10] sm:$0xff]  ;;  %v696_v41 = vld [vmem:[%s897_s2 + $0x20] sm:$0xff] }
  0x1a   :  { %144 = vmatpush.msra.mxu1 %v87_v22  ;;  %174 = vmatpush.msra.mxu2 %v96_v27  ;;  %v66_v40 = vld [vmem:[#allocation5 + $0x20] sm:$0xff]  ;;  %v65_v43 = vld [vmem:[#allocation5 + $0x18] sm:$0xff]  ;;  %v702_v44 = vld [vmem:[%s897_s2 + $0x18] sm:$0xff] }
  0x1b   :  { %122 = vmatpush.msra.mxu0 %v70_v23  ;;  %207 = vmatpush.msra.mxu3 %v672_v24  ;;  %v82_v42 = vld [vmem:[#allocation5 + $0xa0] sm:$0xff]  ;;  %v81_v45 = vld [vmem:[#allocation5 + $0x98] sm:$0xff]  ;;  %v64_v46 = vld [vmem:[#allocation5 + $0x10] sm:$0xff] }
  0x1c   :  { %145 = vmatpush.msra.mxu1 %v86_v26  ;;  %175 = vmatpush.msra.mxu2 %v95_v31  ;;  %v709_v47 = vld [vmem:[%s897_s2 + $0x10] sm:$0xff]  ;;  %v80_v48 = vld [vmem:[#allocation5 + $0x90] sm:$0xff]  ;;  %v63_v49 = vld [vmem:[#allocation5 + $0x8] sm:$0xff] }
  0x1d   :  { %123 = vmatpush.msra.mxu0 %v69_v28  ;;  %208 = vmatpush.msra.mxu3 %v678_v29  ;;  %v716_v50 = vld [vmem:[%s897_s2 + $0x8] sm:$0xff]  ;;  %v79_v51 = vld [vmem:[#allocation5 + $0x88] sm:$0xff]  ;;  %v62_v52 = vld [vmem:[#allocation5] sm:$0xff] }
  0x1e   :  { %146 = vmatpush.msra.mxu1 %v85_v30  ;;  %176 = vmatpush.msra.mxu2 %v94_v35  ;;  %v723_v53 = vld [vmem:[%s897_s2] sm:$0xff]  ;;  %v78_v55 = vld [vmem:[#allocation5 + $0x80] sm:$0xff]  ;;  %v57_v56 = vld [vmem:[#allocation2 + $0x8] sm:$0xff] }
  0x1f   :  { %124 = vmatpush.msra.mxu0 %v68_v32  ;;  %209 = vmatpush.msra.mxu3 %v684_v33  ;;  %v56_v54 = vld [vmem:[#allocation2] sm:$0xff]  ;;  %v61_v58 = vld [vmem:[#allocation2 + $0x28] sm:$0xff]  ;;  %v59_v59 = vld [vmem:[#allocation2 + $0x18] sm:$0xff] }
  0x20   :  { %147 = vmatpush.msra.mxu1 %v84_v34  ;;  %473 = vmatmul.msk.f32.vlgmr.msra.gmra.mxu2 %vm104_vm1, %v58_v39  ;;  %v60_v60 = vld [vmem:[#allocation2 + $0x20] sm:$0xff] }
  0x21   :  { %125 = vmatpush.msra.mxu0 %v67_v36  ;;  %210 = vmatpush.msra.mxu3 %v690_v37  ;;  %v483_v61 = vld [vmem:[%s898_s3] ss:$0 sm:$0xff]  ;;  %v424_v36 = vld [vmem:[%s899_s4 + $0x78] sm:$0xff] }
  0x22   :  { %148 = vmatpush.msra.mxu1 %v83_v38  ;;  %222 = vmatpush.msrb.mxu2 %v631_v1  ;;  %v422_v38 = vld [vmem:[%s899_s4 + $0x68] sm:$0xff]  ;;  %v421_v39 = vld [vmem:[%s899_s4 + $0x60] sm:$0xff] }
  0x23   :  { %126 = vmatpush.msra.mxu0 %v66_v40  ;;  %211 = vmatpush.msra.mxu3 %v696_v41  ;;  %v420_v40 = vld [vmem:[%s899_s4 + $0x58] sm:$0xff] }
  0x24   :  { %149 = vmatpush.msra.mxu1 %v82_v42  ;;  %223 = vmatpush.msrb.mxu2 %v637_v4  ;;  %v418_v42 = vld [vmem:[%s899_s4 + $0x48] sm:$0xff] }
  0x25   :  { %127 = vmatpush.msra.mxu0 %v65_v43  ;;  %212 = vmatpush.msra.mxu3 %v702_v44  ;;  %v417_v43 = vld [vmem:[%s899_s4 + $0x40] sm:$0xff] }
  0x26   :  { %150 = vmatpush.msra.mxu1 %v81_v45  ;;  %224 = vmatpush.msrb.mxu2 %v642_v7 }
  0x27   :  { %128 = vmatpush.msra.mxu0 %v64_v46  ;;  %213 = vmatpush.msra.mxu3 %v709_v47 }
  0x28   :  { %151 = vmatpush.msra.mxu1 %v80_v48  ;;  %225 = vmatpush.msrb.mxu2 %v648_v10 }
  0x29   :  { %129 = vmatpush.msra.mxu0 %v63_v49  ;;  %214 = vmatpush.msra.mxu3 %v716_v50 }
  0x2a   :  { %152 = vmatpush.msra.mxu1 %v79_v51  ;;  %226 = vmatpush.msrb.mxu2 %v654_v13  ;;  %v414_v51 = vld [vmem:[%s899_s4 + $0x28] sm:$0xff] }
  0x2b   :  { %130 = vmatpush.msra.mxu0 %v62_v52  ;;  %215 = vmatpush.msra.mxu3 %v723_v53  ;;  %v413_v52 = vld [vmem:[%s899_s4 + $0x20] sm:$0xff] }
  0x2c   :  { %131 = vmatmul.f32.vlgmr.msra.gmra.mxu0 %v56_v54  ;;  %216 = vmatmul.f32.vlgmr.msra.gmra.mxu3 %v585_v57  ;;  %v411_v54 = vld [vmem:[%s899_s4 + $0x10] sm:$0xff] }
  0x2d   :  { %153 = vmatpush.msra.mxu1 %v78_v55  ;;  %250 = vmatpush.msrb.mxu0 %v631_v1  ;;  %v410_v55 = vld [vmem:[%s899_s4 + $0x8] sm:$0xff] }
  0x2e   :  { %154 = vmatmul.f32.vlgmr.msra.gmra.mxu1 %v57_v56  ;;  %227 = vmatpush.msrb.mxu2 %v660_v16  ;;  %v409_v56 = vld [vmem:[%s899_s4] sm:$0xff] }
  0x2f   :  { %278 = vmatpush.msrb.mxu1 %v631_v1  ;;  %251 = vmatpush.msrb.mxu0 %v637_v4 }
  0x30   :  { %306 = vmatpush.msrb.mxu3 %v631_v1  ;;  %228 = vmatpush.msrb.mxu2 %v666_v20 }
  0x31   :  { %279 = vmatpush.msrb.mxu1 %v637_v4  ;;  %252 = vmatpush.msrb.mxu0 %v642_v7 }
  0x32   :  { %307 = vmatpush.msrb.mxu3 %v637_v4  ;;  %229 = vmatpush.msrb.mxu2 %v672_v24 }
  0x33   :  { %280 = vmatpush.msrb.mxu1 %v642_v7  ;;  %253 = vmatpush.msrb.mxu0 %v648_v10 }
  0x34   :  { %308 = vmatpush.msrb.mxu3 %v642_v7  ;;  %230 = vmatpush.msrb.mxu2 %v678_v29 }
  0x35   :  { %281 = vmatpush.msrb.mxu1 %v648_v10  ;;  %254 = vmatpush.msrb.mxu0 %v654_v13 }
  0x36   :  { %309 = vmatpush.msrb.mxu3 %v648_v10  ;;  %231 = vmatpush.msrb.mxu2 %v684_v33 }
  0x37   :  { %282 = vmatpush.msrb.mxu1 %v654_v13  ;;  %255 = vmatpush.msrb.mxu0 %v660_v16 }
  0x38   :  { %310 = vmatpush.msrb.mxu3 %v654_v13  ;;  %232 = vmatpush.msrb.mxu2 %v690_v37 }
  0x39   :  { %283 = vmatpush.msrb.mxu1 %v660_v16  ;;  %256 = vmatpush.msrb.mxu0 %v666_v20 }
  0x3a   :  { %311 = vmatpush.msrb.mxu3 %v660_v16  ;;  %233 = vmatpush.msrb.mxu2 %v696_v41 }
  0x3b   :  { %284 = vmatpush.msrb.mxu1 %v666_v20  ;;  %257 = vmatpush.msrb.mxu0 %v672_v24 }
  0x3c   :  { %312 = vmatpush.msrb.mxu3 %v666_v20  ;;  %234 = vmatpush.msrb.mxu2 %v702_v44 }
  0x3d   :  { %285 = vmatpush.msrb.mxu1 %v672_v24  ;;  %258 = vmatpush.msrb.mxu0 %v678_v29 }
  0x3e   :  { %313 = vmatpush.msrb.mxu3 %v672_v24  ;;  %235 = vmatpush.msrb.mxu2 %v709_v47 }
  0x3f   :  { %286 = vmatpush.msrb.mxu1 %v678_v29  ;;  %259 = vmatpush.msrb.mxu0 %v684_v33 }
  0x40   :  { %314 = vmatpush.msrb.mxu3 %v678_v29  ;;  %236 = vmatpush.msrb.mxu2 %v716_v50 }
  0x41   :  { %287 = vmatpush.msrb.mxu1 %v684_v33  ;;  %260 = vmatpush.msrb.mxu0 %v690_v37 }
  0x42   :  { %315 = vmatpush.msrb.mxu3 %v684_v33  ;;  %237 = vmatpush.msrb.mxu2 %v723_v53 }
  0x43   :  { %288 = vmatpush.msrb.mxu1 %v690_v37  ;;  %261 = vmatpush.msrb.mxu0 %v696_v41 }
  0x44   :  { %316 = vmatpush.msrb.mxu3 %v690_v37  ;;  %328 = vmatpush.msra.mxu2 %v631_v1 }
  0x45   :  { %289 = vmatpush.msrb.mxu1 %v696_v41  ;;  %262 = vmatpush.msrb.mxu0 %v702_v44 }
  0x46   :  { %317 = vmatpush.msrb.mxu3 %v696_v41  ;;  %329 = vmatpush.msra.mxu2 %v637_v4 }
  0x47   :  { %290 = vmatpush.msrb.mxu1 %v702_v44  ;;  %263 = vmatpush.msrb.mxu0 %v709_v47 }
  0x48   :  { %318 = vmatpush.msrb.mxu3 %v702_v44  ;;  %330 = vmatpush.msra.mxu2 %v642_v7 }
  0x49   :  { %291 = vmatpush.msrb.mxu1 %v709_v47  ;;  %264 = vmatpush.msrb.mxu0 %v716_v50 }
  0x4a   :  { %319 = vmatpush.msrb.mxu3 %v709_v47  ;;  %331 = vmatpush.msra.mxu2 %v648_v10 }
  0x4b   :  { %292 = vmatpush.msrb.mxu1 %v716_v50  ;;  %265 = vmatpush.msrb.mxu0 %v723_v53 }
  0x4c   :  { %320 = vmatpush.msrb.mxu3 %v716_v50  ;;  %332 = vmatpush.msra.mxu2 %v654_v13 }
  0x4d   :  { %293 = vmatpush.msrb.mxu1 %v723_v53  ;;  %356 = vmatpush.msra.mxu0 %v631_v1 }
  0x4e   :  { %321 = vmatpush.msrb.mxu3 %v723_v53  ;;  %333 = vmatpush.msra.mxu2 %v660_v16 }
  0x4f   :  { %384 = vmatpush.msra.mxu1 %v631_v1  ;;  %357 = vmatpush.msra.mxu0 %v637_v4 }
  0x50   :  { %334 = vmatpush.msra.mxu2 %v666_v20  ;;  %134 = vmatmul.f32.gmra.mxu0 %v59_v59 }
  0x51   :  { %385 = vmatpush.msra.mxu1 %v637_v4  ;;  %358 = vmatpush.msra.mxu0 %v642_v7 }
  0x52   :  { %335 = vmatpush.msra.mxu2 %v672_v24  ;;  %157 = vmatmul.f32.gmra.mxu1 %v60_v60 }
  0x53   :  { %386 = vmatpush.msra.mxu1 %v642_v7  ;;  %359 = vmatpush.msra.mxu0 %v648_v10 }
  0x54   :  { %336 = vmatpush.msra.mxu2 %v678_v29  ;;  %432 = vmatpush.msra.mxu3 %v424_v36 }
  0x55   :  { %387 = vmatpush.msra.mxu1 %v648_v10  ;;  %360 = vmatpush.msra.mxu0 %v654_v13 }
  0x56   :  { %337 = vmatpush.msra.mxu2 %v684_v33 }
  0x57   :  { %388 = vmatpush.msra.mxu1 %v654_v13  ;;  %361 = vmatpush.msra.mxu0 %v660_v16 }
  0x58   :  { %338 = vmatpush.msra.mxu2 %v690_v37 }
  0x59   :  { %389 = vmatpush.msra.mxu1 %v660_v16  ;;  %362 = vmatpush.msra.mxu0 %v666_v20 }
  0x5a   :  { %339 = vmatpush.msra.mxu2 %v696_v41 }
  0x5b   :  { %390 = vmatpush.msra.mxu1 %v666_v20  ;;  %363 = vmatpush.msra.mxu0 %v672_v24 }
  0x5c   :  { %340 = vmatpush.msra.mxu2 %v702_v44 }
  0x5d   :  { %391 = vmatpush.msra.mxu1 %v672_v24  ;;  %364 = vmatpush.msra.mxu0 %v678_v29 }
  0x5e   :  { %341 = vmatpush.msra.mxu2 %v709_v47 }
  0x5f   :  { %392 = vmatpush.msra.mxu1 %v678_v29  ;;  %365 = vmatpush.msra.mxu0 %v684_v33 }
  0x60   :  { %342 = vmatpush.msra.mxu2 %v716_v50 }
  0x61   :  { %393 = vmatpush.msra.mxu1 %v684_v33  ;;  %366 = vmatpush.msra.mxu0 %v690_v37 }
  0x62   :  { %343 = vmatpush.msra.mxu2 %v723_v53 }
  0x63   :  { %394 = vmatpush.msra.mxu1 %v690_v37  ;;  %367 = vmatpush.msra.mxu0 %v696_v41  ;;  %v423_v37 = vld [vmem:[%s899_s4 + $0x70] sm:$0xff] }
  0x64   :  { %474 = vmatmul.msk.f32.gmra.mxu2 %vm104_vm1, %v61_v58  ;;  %433 = vmatpush.msra.mxu3 %v423_v37 }
  0x65   :  { %395 = vmatpush.msra.mxu1 %v696_v41  ;;  %368 = vmatpush.msra.mxu0 %v702_v44  ;;  %v419_v41 = vld [vmem:[%s899_s4 + $0x50] sm:$0xff] }
  0x66   :  { %434 = vmatpush.msra.mxu3 %v422_v38 }
  0x67   :  { %396 = vmatpush.msra.mxu1 %v702_v44  ;;  %369 = vmatpush.msra.mxu0 %v709_v47  ;;  %v416_v44 = vld [vmem:[%s899_s4 + $0x38] sm:$0xff] }
  0x68   :  { %435 = vmatpush.msra.mxu3 %v421_v39 }
  0x69   :  { %397 = vmatpush.msra.mxu1 %v709_v47  ;;  %370 = vmatpush.msra.mxu0 %v716_v50 }
  0x6a   :  { %436 = vmatpush.msra.mxu3 %v420_v40 }
  0x6b   :  { %398 = vmatpush.msra.mxu1 %v716_v50  ;;  %371 = vmatpush.msra.mxu0 %v723_v53  ;;  %v415_v50 = vld [vmem:[%s899_s4 + $0x30] sm:$0xff] }
  0x6c   :  { %437 = vmatpush.msra.mxu3 %v419_v41 }
  0x6d   :  { %399 = vmatpush.msra.mxu1 %v723_v53  ;;  %v412_v53 = vld [vmem:[%s899_s4 + $0x18] sm:$0xff] }
  0x6e   :  { %438 = vmatpush.msra.mxu3 %v418_v42 }
  0x70   :  { %439 = vmatpush.msra.mxu3 %v417_v43 }
  0x72   :  { %440 = vmatpush.msra.mxu3 %v416_v44 }
  0x74   :  { %441 = vmatpush.msra.mxu3 %v415_v50 }
  0x76   :  { %442 = vmatpush.msra.mxu3 %v414_v51 }
  0x78   :  { %443 = vmatpush.msra.mxu3 %v413_v52 }
  0x7a   :  { %444 = vmatpush.msra.mxu3 %v412_v53 }
  0x7c   :  { %445 = vmatpush.msra.mxu3 %v411_v54 }
  0x7e   :  { %446 = vmatpush.msra.mxu3 %v410_v55 }
  0x80   :  { %447 = vmatpush.msra.mxu3 %v409_v56 }
  0xa3   :  { %v178_v1 = vpop.f32.mrf.mxu2 }
  0xa9   :  { %v132_v62 = vpop.f32.mrf.mxu0 }
  0xaa   :  { %v133_v63 = vadd.f32 %v483_v61, %v132_v62  ;;  %v484_v62 = vld [vmem:[%s900_s5] ss:$0 sm:$0xff] }
  0xab   :  { %v155_v0 = vpop.f32.mrf.mxu1 }
  0xac   :  { %v156_v2 = vadd.f32 %v155_v0, %v133_v63 }
  0xae   :  { %v179_v3 = vadd.f32 %v178_v1, %v156_v2 }
  0xaf   :  { %v217_v4 = vpop.f32.mrf.mxu3 }
  0xb0   :  { %v220_v5 = vadd.f32 %v217_v4, %v179_v3 }
  0xb2   :  { %485 = vtanh.f32 %v220_v5 }
  0xb8   :  { %v486_v6 = vpop.eup %485 }
  0xb9   :  { %238 = vmatmul.f32.vlgmr.msrb.gmra.mxu2 %v486_v6 }
  0xcd   :  { %v135_v13 = vpop.f32.mrf.mxu0 }
  0xce   :  { %v136_v25 = vadd.f32 %v483_v61, %v135_v13 }
  0xcf   :  { %v158_v19 = vpop.f32.mrf.mxu1 }
  0xd0   :  { %v159_v26 = vadd.f32 %v158_v19, %v136_v25 }
  0xe7   :  { %v181_v7 = vpop.f32.mrf.mxu2 }
  0xe8   :  { %v182_v27 = vadd.f32 %v181_v7, %v159_v26 }
 0x13c   :  { %v239_v8 = vpop.f32.mrf.mxu2 }
 0x13d   :  { %v243_v9 = vrot.slane %v239_v8, 6 }
 0x13f   :  { %v245_v10 = vadd.f32 %v243_v9, %v179_v3 }
 0x141   :  { %487 = vtanh.f32 %v245_v10 }
 0x147   :  { %v488_v11 = vpop.eup %487 }
 0x148   :  { %v248_v12 = vrot.slane %v488_v11, 2 }
 0x14a   :  { %266 = vmatmul.f32.vlgmr.msrb.gmra.mxu0 %v248_v12 }
 0x1c7   :  { %v267_v14 = vpop.f32.mrf.mxu0 }
 0x1c8   :  { %v271_v15 = vrot.slane %v267_v14, 4 }
 0x1ca   :  { %v273_v16 = vadd.f32 %v271_v15, %v179_v3 }
 0x1cc   :  { %489 = vtanh.f32 %v273_v16 }
 0x1d2   :  { %v490_v17 = vpop.eup %489 }
 0x1d3   :  { %v276_v18 = vrot.slane %v490_v17, 4 }
 0x1d5   :  { %294 = vmatmul.f32.vlgmr.msrb.gmra.mxu1 %v276_v18 }
 0x252   :  { %v295_v20 = vpop.f32.mrf.mxu1 }
 0x253   :  { %v299_v21 = vrot.slane %v295_v20, 2 }
 0x255   :  { %v301_v22 = vadd.f32 %v299_v21, %v179_v3 }
 0x257   :  { %491 = vtanh.f32 %v301_v22 }
 0x25d   :  { %v492_v23 = vpop.eup %491 }
 0x25e   :  { %v304_v24 = vrot.slane %v492_v23, 6 }
 0x260   :  { %322 = vmatmul.f32.vlgmr.msrb.gmra.mxu3 %v304_v24 }
 0x2e3   :  { %v323_v28 = vpop.f32.mrf.mxu3 }
 0x2e4   :  { %v326_v29 = vadd.f32 %v323_v28, %v182_v27 }
 0x2e6   :  { %493 = vtanh.f32 %v326_v29 }
 0x2ec   :  { %v494_v30 = vpop.eup %493 }
 0x2ed   :  { %344 = vmatmul.f32.vlgmr.msra.gmra.mxu2 %v494_v30 }
 0x370   :  { %v345_v31 = vpop.f32.mrf.mxu2 }
 0x371   :  { %v349_v32 = vrot.slane %v345_v31, 6 }
 0x373   :  { %v351_v33 = vadd.f32 %v349_v32, %v182_v27 }
 0x375   :  { %495 = vtanh.f32 %v351_v33 }
 0x37b   :  { %v496_v34 = vpop.eup %495 }
 0x37c   :  { %v354_v35 = vrot.slane %v496_v34, 2 }
 0x37e   :  { %372 = vmatmul.f32.vlgmr.msra.gmra.mxu0 %v354_v35 }
 0x3fb   :  { %v373_v45 = vpop.f32.mrf.mxu0 }
 0x3fc   :  { %v377_v46 = vrot.slane %v373_v45, 4 }
 0x3fe   :  { %v379_v47 = vadd.f32 %v377_v46, %v182_v27 }
 0x400   :  { %497 = vtanh.f32 %v379_v47 }
 0x406   :  { %v498_v48 = vpop.eup %497 }
 0x407   :  { %v382_v49 = vrot.slane %v498_v48, 4 }
 0x409   :  { %400 = vmatmul.f32.vlgmr.msra.gmra.mxu1 %v382_v49 }
 0x486   :  { %v401_v57 = vpop.f32.mrf.mxu1 }
 0x487   :  { %v405_v58 = vrot.slane %v401_v57, 2 }
 0x489   :  { %v407_v59 = vadd.f32 %v405_v58, %v182_v27 }
 0x48b   :  { %499 = vtanh.f32 %v407_v59 }
 0x491   :  { %v500_v60 = vpop.eup %499 }
 0x492   :  { %v430_v61 = vrot.slane %v500_v60, 6 }
 0x494   :  { %448 = vmatmul.f32.vlgmr.msra.gmra.mxu3 %v430_v61 }
 0x517   :  { %v449_v63 = vpop.f32.mrf.mxu3 }
 0x518   :  { %v450_v0 = vadd.f32 %v484_v62, %v449_v63 }
 0x51a   :  { %453 = vst.msk [vmem:[#allocation7] sm:$0x3] %vm452_vm2, %v450_v0 }
 0x51b   :  { %464 = dma.vmem_to_hbm [thread:$0]  %s460_s22, 32, %s462_s25, [#allocation4]  }
 0x51c   :  { %577 = dma.done.wait [#allocation4], 32  }
 0x51d   :  { %578 = vsyncadd [#allocation4], 4294967264 }
 0x51e   :  { %469 = vsyncpa [#allocation3], 1 }
 0x51f   :  { %470 = vsyncpa [#allocation6], 1 }
 0x520   :  { %471 = vsyncpa [#allocation4], 1 }

</bundles_post_ra>
